<compile_context>
chip_gen: v7x
topology: tpu7x:2x2x1
jax: 0.10.0
libtpu: 0.0.40
codegen_flags: <defaults>
</compile_context>

<pallas_src>
import jax
import jax.numpy as jnp
from jax.experimental import pallas as pl
from jax.experimental.pallas import tpu as pltpu


def _spgate_kernel(x_ref, w_ref, o1_ref, o2_ref):
    # x_ref:  (C, TL)  one image's channels x a spatial lane-tile
    # w_ref:  (1, C)   squeezed 1x1-conv weight (out=1, in=C)
    x = x_ref[...]
    # 1x1 conv to a single channel == (1, C) @ (C, TL); native-dtype operands,
    # f32 MXU accumulate.
    logits = jnp.dot(
        w_ref[...].astype(x.dtype),
        x,
        preferred_element_type=jnp.float32,
    )                                               # (1, TL) f32
    z = jax.nn.sigmoid(logits).astype(x.dtype)      # broadcast over sublanes
    xz = x * z
    o1_ref[...] = xz
    o2_ref[...] = x - xz                            # == x * (1 - z)


def spgate_pallas(x_nchw, w_row, *,
                  vmem_budget_bytes=12 * 1024 * 1024,
                  min_tile_l=512,
                  max_tile_l=16384):
    """x_nchw: (b, c, h, w). w_row: (1, c) = Conv2d(c,1,1,bias=False).weight[:, :, 0, 0]."""
    b, c, h, w_sp = x_nchw.shape
    hw = h * w_sp
    itemsize = jnp.dtype(x_nchw.dtype).itemsize

    # VMEM-aware lane-tile cap: 3 streams (x, out1, out2) x double buffer.
    bytes_per_lane = 6 * c * itemsize
    cap = (vmem_budget_bytes // bytes_per_lane) // 128 * 128
    cap = max(min_tile_l, min(max_tile_l, cap))

    if hw <= cap:
        # Single full-extent spatial block per image (full array dim is always a
        # legal block extent, even if not a multiple of 128).
        tile_l = hw
        num_tiles = 1
    else:
        # Large 128-multiple tile; ragged last tile is masked by Pallas.
        tile_l = cap
        num_tiles = pl.cdiv(hw, tile_l)

    # Free view: NCHW -> (b, c, h*w). No transpose, no extra HBM pass.
    x_flat = x_nchw.reshape(b, c, hw)

    grid = (b, num_tiles)

    out1, out2 = pl.pallas_call(
        _spgate_kernel,
        out_shape=(
            jax.ShapeDtypeStruct((b, c, hw), x_nchw.dtype),
            jax.ShapeDtypeStruct((b, c, hw), x_nchw.dtype),
        ),
        grid_spec=pltpu.PrefetchScalarGridSpec(
            num_scalar_prefetch=0,
            grid=grid,
            in_specs=[
                # batch dim squeezed out of the kernel ref via None
                pl.BlockSpec((None, c, tile_l), lambda bi, si: (bi, 0, si)),  # x
                pl.BlockSpec((1, c), lambda bi, si: (0, 0)),                  # w
            ],
            out_specs=[
                pl.BlockSpec((None, c, tile_l), lambda bi, si: (bi, 0, si)),
                pl.BlockSpec((None, c, tile_l), lambda bi, si: (bi, 0, si)),
            ],
        ),
        compiler_params=pltpu.CompilerParams(
            dimension_semantics=("parallel", "parallel"),
        ),
    )(x_flat, w_row)

    return out1.reshape(b, c, h, w_sp), out2.reshape(b, c, h, w_sp)


def spgate_ref(x_nchw, w_row):
    """Pure-JAX reference matching the PyTorch forward."""
    z = jax.nn.sigmoid(jnp.einsum('bchw,c->bhw', x_nchw, w_row[0]))[:, None, :, :]
    return x_nchw * z, x_nchw * (1.0 - z)


if __name__ == "__main__":
    # Small shapes consistent with the module (default channel=256, scaled down).
    B, C, H, W = 2, 32, 16, 16

    key = jax.random.PRNGKey(0)
    k_x, k_w = jax.random.split(key, 2)

    x = jax.random.normal(k_x, (B, C, H, W), dtype=jnp.float32)
    # PyTorch Conv2d(C, 1, 1, bias=False).weight has shape (1, C, 1, 1);
    # we store it squeezed as a (1, C) row.
    w = jax.random.normal(k_w, (1, C), dtype=jnp.float32) * 0.1

    out1, out2 = spgate_pallas(x, w)
    jax.block_until_ready((out1, out2))

    ref1, ref2 = spgate_ref(x, w)
    assert jnp.allclose(out1, ref1, atol=1e-5, rtol=1e-5)
    assert jnp.allclose(out2, ref2, atol=1e-5, rtol=1e-5)

    print("KERNEL_OK")
</pallas_src>

<mosaic_0001>
module attributes {stable_mosaic.version = 11 : i64} {
  func.func @_spgate_kernel(%arg0: i32, %arg1: i32, %arg2: memref<1x32x256xf32, #tpu.memory_space<vmem>>, %arg3: memref<1x32xf32, #tpu.memory_space<vmem>>, %arg4: memref<1x32x256xf32, #tpu.memory_space<vmem>>, %arg5: memref<1x32x256xf32, #tpu.memory_space<vmem>>) attributes {dimension_semantics = [#tpu.dimension_semantics<parallel>, #tpu.dimension_semantics<parallel>], iteration_bounds = array<i64: 2, 1>, scalar_prefetch = 0 : i64, scratch_operands = 0 : i64, tpu.core_type = #tpu.core_type<tc>, window_params = [{transform_indices = @transform_0, window_bounds = array<i64: 1, 32, 256>}, {pipeline_mode = #tpu.pipeline_mode<synchronous>, transform_indices = @transform_1, window_bounds = array<i64: 1, 32>}, {transform_indices = @transform_2, window_bounds = array<i64: 1, 32, 256>}, {transform_indices = @transform_3, window_bounds = array<i64: 1, 32, 256>}]} {
    %c0 = arith.constant 0 : index
    %c0_0 = arith.constant 0 : index
    %c0_1 = arith.constant 0 : index
    %0 = vector.load %arg2[%c0, %c0_0, %c0_1] : memref<1x32x256xf32, #tpu.memory_space<vmem>>, vector<1x32x256xf32>
    %1 = vector.shape_cast %0 : vector<1x32x256xf32> to vector<32x256xf32>
    %c0_2 = arith.constant 0 : index
    %c0_3 = arith.constant 0 : index
    %2 = vector.load %arg3[%c0_2, %c0_3] : memref<1x32xf32, #tpu.memory_space<vmem>>, vector<1x32xf32>
    %cst = arith.constant dense<0.000000e+00> : vector<1x256xf32>
    %3 = tpu.matmul %2, %1, %cst {dimension_numbers = #tpu.dot_dimension_numbers<[1], [0], [0], [1], [0, 0, 1, 1], [], []>} : vector<1x32xf32>, vector<32x256xf32>, vector<1x256xf32> -> vector<1x256xf32>
    %4 = arith.negf %3 : vector<1x256xf32>
    %5 = math.exp %4 : vector<1x256xf32>
    %cst_4 = arith.constant 1.000000e+00 : f32
    %6 = vector.broadcast %cst_4 : f32 to vector<1x256xf32>
    %7 = arith.addf %6, %5 : vector<1x256xf32>
    %8 = arith.divf %6, %7 : vector<1x256xf32>
    %9 = vector.broadcast %8 : vector<1x256xf32> to vector<32x256xf32>
    %10 = arith.mulf %1, %9 : vector<32x256xf32>
    %c0_5 = arith.constant 0 : index
    %c0_6 = arith.constant 0 : index
    %c0_7 = arith.constant 0 : index
    %11 = vector.load %arg4[%c0_5, %c0_6, %c0_7] : memref<1x32x256xf32, #tpu.memory_space<vmem>>, vector<1x32x256xf32>
    %12 = vector.shape_cast %11 : vector<1x32x256xf32> to vector<32x256xf32>
    %13 = vector.shape_cast %10 : vector<32x256xf32> to vector<1x32x256xf32>
    tpu.vector_store %arg4[%c0_5, %c0_6, %c0_7], %13 {strides = array<i32>} : memref<1x32x256xf32, #tpu.memory_space<vmem>>, vector<1x32x256xf32>,
    %14 = arith.subf %1, %10 : vector<32x256xf32>
    %c0_8 = arith.constant 0 : index
    %c0_9 = arith.constant 0 : index
    %c0_10 = arith.constant 0 : index
    %15 = vector.load %arg5[%c0_8, %c0_9, %c0_10] : memref<1x32x256xf32, #tpu.memory_space<vmem>>, vector<1x32x256xf32>
    %16 = vector.shape_cast %15 : vector<1x32x256xf32> to vector<32x256xf32>
    %17 = vector.shape_cast %14 : vector<32x256xf32> to vector<1x32x256xf32>
    tpu.vector_store %arg5[%c0_8, %c0_9, %c0_10], %17 {strides = array<i32>} : memref<1x32x256xf32, #tpu.memory_space<vmem>>, vector<1x32x256xf32>,
    return
  }
  func.func @transform_0(%arg0: i32, %arg1: i32) -> (i32, i32, i32) {
    %c0_i32 = arith.constant 0 : i32
    %c0_i32_0 = arith.constant 0 : i32
    return %arg0, %c0_i32, %arg1 : i32, i32, i32
  }
  func.func @transform_1(%arg0: i32, %arg1: i32) -> (i32, i32) {
    %c0_i32 = arith.constant 0 : i32
    %c0_i32_0 = arith.constant 0 : i32
    %c0_i32_1 = arith.constant 0 : i32
    return %c0_i32, %c0_i32_0 : i32, i32
  }
  func.func @transform_2(%arg0: i32, %arg1: i32) -> (i32, i32, i32) {
    %c0_i32 = arith.constant 0 : i32
    %c0_i32_0 = arith.constant 0 : i32
    return %arg0, %c0_i32, %arg1 : i32, i32, i32
  }
  func.func @transform_3(%arg0: i32, %arg1: i32) -> (i32, i32, i32) {
    %c0_i32 = arith.constant 0 : i32
    %c0_i32_0 = arith.constant 0 : i32
    return %arg0, %c0_i32, %arg1 : i32, i32, i32
  }
}

</mosaic_0001>

<bundles_post_ra>
// kernel: tpu_custom_call.1
= control target key start
LH: loop header
LB: loop body
LE: loop exit
PB: predicated region body
PF: predicated region fallthrough
CT: control target
= control target key end

     0   :  { %9 = vsyncpa [#allocation3], 0  ;;  %s1082_s0 = inlined_call_operand.hbm [shape: f32[2,32,256], index: 0, kind: input, shape index: {}]   ;;  %s1083_s1 = inlined_call_operand.vmem [shape: f32[1,32], index: 1, kind: input, shape index: {}]   ;;  %s1084_s2 = inlined_call_operand.hbm [shape: f32[2,32,256], index: 2, kind: output, shape index: {0}]   ;;  %s1085_s3 = inlined_call_operand.hbm [shape: f32[2,32,256], index: 3, kind: output, shape index: {1}]  }
   0x1   :  { %11 = vsyncpa [#allocation3 + $0x1], 0 }
   0x2   :  { %12 = vsyncpa [#allocation4], 0 }
   0x3   :  { %14 = vsyncpa [#allocation4 + $0x1], 0 }
   0x4   :  { %15 = vsyncpa [#allocation7], 0 }
   0x5   :  { %17 = vsyncpa [#allocation7 + $0x1], 0  ;;  %s807_s12 = smov 0   ;;  %s809_s13 = smov 0  }
   0x6   :  { %s811_s14 = smov 0   ;;  %s813_s15 = smov 0  }
   0x7   :  { %s815_s16 = smov 0   ;;  %s817_s17 = smov 0  }
   0x8 LB: > { %s520_s18 = sadd.s32 4294967295, %s777_s17   ;;  %s521_s19 = sadd.s32 4294967294, %s777_s17   ;;  %s777_s17 = sphi %s817_s17, %s23_s17   ;;  %s773_s16 = sphi %s815_s16, %s1100_s16   ;;  %s769_s15 = sphi %s813_s15, %s1099_s15   ;;  %s765_s14 = sphi %s811_s14, %s1098_s14   ;;  %s761_s13 = sphi %s809_s13, %s1097_s13   ;;  %s757_s12 = sphi %s807_s12, %s1096_s12  }
   0x9   : > { %s35_s20 = sadd.s32 1, %s773_s16  ;;  %s44_s21 = sadd.s32 1, %s765_s14 }
   0xa   : > { %p37_p0 = scmp.ge.s32.totalorder %s35_s20, 2  ;;  %p51_p1 = scmp.ne.s32.totalorder %s765_s14, %s761_s13 }
   0xb   : > { %p52_p2 = scmp.eq.s32.totalorder %s777_s17, 0  ;;  %p57_p3 = scmp.ne.s32.totalorder %s761_s13, %s757_s12 }
   0xc   : > { %s1102_s20 = smov (%p37_p0, %s35_s20), 0  ;;  %p58_p5 = scmp.eq.s32.totalorder %s520_s18, 0 }
   0xd   : > { %p848_p4 = por %p52_p2, %p51_p1  ;;  %s39_s23 = ssub.s32 %s773_s16, %s1102_s20 }
   0xe   : > { %p104_p6 = scmp.eq.s32.totalorder %s520_s18, 1  ;;  %p42_p7 = scmp.eq.s32.totalorder %s39_s23, 0 }
   0xf   : > { %p854_p8 = por %p58_p5, %p57_p3  ;;  %p110_p10 = scmp.eq.s32.totalorder %s521_s19, 1 }
  0x10   : > { %p858_p9 = por %p104_p6, %p51_p1  ;;  %p570_p13 = scmp.lt.s32.totalorder %s777_s17, 2 }
  0x11   : > { %s863_s26 = scalar_select %p42_p7, %s765_s14, %s44_s21  }
  0x12   : > { %s1089_s25 = scalar_select %p858_p9, 1, 0 }
  0x13   : > { %p865_p11 = por %p110_p10, %p57_p3  ;;  %s161_s28 = sand.u32 1, %s765_s14  }
  0x14   : > { %s524_s29 = sshll.u32 %s161_s28, 6  ;;  %s542_s30 = sshll.u32 %s773_s16, 10 }
  0x15   : > { %s1090_s27 = scalar_select %p865_p11, 1, 0 }
  0x16   : > { %s876_s6 = scalar_lea.hbm %s1082_s0, %s542_s30  ;;  %s165_s7 = scalar_lea.vmem [#allocation2], %s524_s29 }
  0x17   : > { %s174_s8 = sshll.u32 %s165_s7, 4  ;;  %p882_p0 = pnand %p570_p13, %p848_p4  ;;  %s878_s8 = int_to_ptr.vmem [resolvable:$true] %s174_s8 }
  0x18   : > { %s887_s10 = scalar_lea.sflag [#allocation3], %s161_s28  ;;  %s633_s11 = scalar_lea.hbm %s876_s6, 1024 }
  0x19   : > { %p634_p2 = scmp.ne.s32.totalorder %s876_s6, %s633_s11  ;;  %p635_p3 = pneg %p882_p0 }
  0x1a   : > { %s638_s21 = scalar_lea.hbm %s1082_s0, 2048  ;;  %p639_p4 = scmp.lt.u32.totalorder %s876_s6, %s1082_s0 }
  0x1b   : > { %p636_p5 = pnand %p635_p3, %p634_p2  ;;  %p640_p7 = scmp.lt.u32.totalorder %s638_s21, %s633_s11 }
  0x1c   : > { %p642_p13 = scmp.lt.u32.totalorder %s633_s11, %s876_s6 }
  0x1d   : > { %p637_p6 = pneg %p636_p5  ;;  %p641_p10 = por %p640_p7, %p639_p4 }
  0x1f   : > { %p643_p12 = por %p642_p13, %p641_p10 }
  0x21   : > { %p644_p1 = pnand %p643_p12, %p637_p6 }
  0x23   : > { %647 = shalt.err (!%p644_p1)
}
  0x24   : > { %s648_s28 = scalar_lea.vmem %s878_s8, 1024  ;;  %s779_s29 = smov [#allocation2]  }
  0x25   : > { %p649_p2 = scmp.ne.s32.totalorder %s878_s8, %s648_s28  ;;  %s653_s30 = sshll.u32 %s779_s29, 4  ;;  %s654_s30 = int_to_ptr.vmem [resolvable:$false] %s653_s30 }
  0x26   : > { %s655_s4 = scalar_lea.vmem %s654_s30, 2048  ;;  %p656_p9 = scmp.lt.s32.totalorder %s878_s8, %s654_s30 }
  0x27   : > { %p651_p5 = pnand %p649_p2, %p635_p3  ;;  %p657_p4 = scmp.lt.s32.totalorder %s655_s4, %s648_s28 }
  0x29   : > { %p652_p11 = pneg %p651_p5  ;;  %p658_p7 = por %p657_p4, %p656_p9 }
  0x2b   : > { %p659_p10 = pnand %p658_p7, %p652_p11 }
  0x2d   : > { %662 = shalt.err (!%p659_p10)
}
  0x2e   : > { %s780_s5 = smov 256   ;;  %s781_s7 = smov 16  }
  0x2f   : > { %562 = dma.hbm_to_vmem [thread:$0]  (!%p882_p0), %s876_s6, 1024, %s878_s8, %s887_s10, %s780_s5, %s780_s5, %s781_s7  }
  0x30   : > { %p182_p12 = scmp.lt.s32.totalorder %s777_s17, 3  ;;  %p1092_p1 = scmp.ge.s32.totalorder %s777_s17, 1 }
  0x32   : > { %p183_p3 = pnand %p1092_p1, %p182_p12 }
  0x33   : > { %s919_s11 = sand.u32 (!%p183_p3), 1, %s761_s13  }
  0x34   : > { %186 = sbr.rel (%p183_p3) target bundleno = 356 (0x164), region = 28  ;;  %s922_s18 = sshll.u32 (!%p183_p3), %s919_s11, 6 }
  0x35   : > { %s189_s19 = scalar_lea.sflag (!%p183_p3), [#allocation3], %s919_s11  ;;  %s192_s21 = scalar_lea.vmem (!%p183_p3), [#allocation2], %s922_s18 }
  0x3b   : > { %744 = dma.done.wait (%p854_p8), %s189_s19, 1024  }
  0x3c   : > { %746 = vsyncadd (%p854_p8), %s189_s19, 4294966272  ;;  %v782_v0 = vmov 0.0   ;;  %v930_v1 = vld [vmem:[%s192_s21 + $0x8] sm:$0xff]  ;;  %v932_v2 = vld [vmem:[%s192_s21 + $0x18] sm:$0xff]  ;;  %vm232_vm0 = vcmask 261120   ;;  %v319_v21 = vlaneseq  ;;  %s543_s8 = sshll.u32 %s769_s15, 10 }
  0x3d   : > { %300 = vmatprep.mubr.f32.mxu0 %v782_v0  ;;  %v934_v3 = vld [vmem:[%s192_s21] sm:$0xff]  ;;  %v545_v4 = vpack.c.bf16 %v932_v2, %v930_v1  ;;  %v938_v5 = vld [vmem:[%s192_s21 + $0x10] sm:$0xff]  ;;  %v940_v6 = vld [vmem:[%s192_s21 + $0x28] sm:$0xff]  ;;  %s212_s9 = scalar_lea.vmem [#allocation5], %s922_s18  ;;  %s964_s28 = scalar_lea.hbm %s1084_s2, %s543_s8 }
  0x3e   : > { %v942_v7 = vld [vmem:[%s192_s21 + $0x38] sm:$0xff]  ;;  %v547_v8 = vpack.c.bf16 %v938_v5, %v934_v3  ;;  %v948_v10 = vld [vmem:[%s192_s21 + $0x20] sm:$0xff]  ;;  %v950_v11 = vld [vmem:[%s192_s21 + $0x30] sm:$0xff]  ;;  %v320_v23 = vshrl.u32 %v319_v21, 7  ;;  %s380_s10 = sshll.u32 %s212_s9, 4  ;;  %s973_s29 = scalar_lea.vmem [#allocation6], %s922_s18  ;;  %s970_s10 = int_to_ptr.vmem [resolvable:$true] %s380_s10 }
  0x3f   : > { %v549_v9 = vpack.c.bf16 %v942_v7, %v940_v6  ;;  %546 = vmatprep.subr.bf16.mxu0 %v545_v4  ;;  %v551_v12 = vpack.c.bf16 %v950_v11, %v948_v10  ;;  %v231_v13 = vld [vmem:[%s1083_s1] sm:$0x1]  ;;  %s398_s30 = sshll.u32 %s973_s29, 4  ;;  %s993_s7 = scalar_lea.hbm %s1085_s3, %s543_s8  ;;  %s995_s30 = int_to_ptr.vmem [resolvable:$true] %s398_s30 }
  0x40   : > { %548 = vmatpush1.bf16.msra.mxu0 %v547_v8  ;;  %v321_v24 = vsub.s32 0, %v320_v23  ;;  %s360_s18 = scalar_lea.sflag [#allocation4], %s919_s11  ;;  %s663_s19 = scalar_lea.vmem %s970_s10, 1024 }
  0x41   : > { %550 = vmatprep.subr.bf16.mxu0 %v549_v9  ;;  %p664_p8 = scmp.ne.s32.totalorder %s970_s10, %s663_s19  ;;  %p1093_p9 = scmp.ne.s32.totalorder %s1089_s25, 0 }
  0x42   : > { %s783_s21 = smov [#allocation5]  }
  0x43   : > { %p665_p11 = pnand %p664_p8, %p1093_p9  ;;  %s667_s15 = sshll.u32 %s783_s21, 4  ;;  %s668_s15 = int_to_ptr.vmem [resolvable:$false] %s667_s15 }
  0x44   : > { %552 = vmatpush1.bf16.msra.mxu0 %v551_v12  ;;  %s669_s24 = scalar_lea.vmem %s668_s15, 2048  ;;  %p670_p6 = scmp.lt.s32.totalorder %s970_s10, %s668_s15 }
  0x45   : > { %p666_p0 = pneg %p665_p11  ;;  %p671_p13 = scmp.lt.s32.totalorder %s669_s24, %s663_s19 }
  0x47   : > { %531 = vmatmul.mubr.msk.f32.vlgmr.msra.gmra.mrb[0].mxu0 %vm232_vm0, %v231_v13  ;;  %p672_p2 = por %p671_p13, %p670_p6 }
  0x49   : > { %p673_p5 = pnand %p672_p2, %p666_p0 }
 0x11a   : > { %v302_v14 = vpop.f32.mrb[0].mxu0 }
 0x11b   : > { %v532_v15 = vmul.f32 -1.442695, %v302_v14  ;;  %v304_v16 = vpop.f32.mrb[1].mxu0 }
 0x11c   : > { %v533_v17 = vmul.f32 -1.442695, %v304_v16 }
 0x11d   : > { %625 = vpow2.f32 %v532_v15 }
 0x11e   : > { %627 = vpow2.f32 %v533_v17 }
 0x127   : > { %v626_v18 = vpop.eup %625 }
 0x128   : > { %v628_v19 = vpop.eup %627  ;;  %v313_v20 = vadd.f32 1.0, %v626_v18 }
 0x129   : > { %v314_v22 = vadd.f32 1.0, %v628_v19 }
 0x12a   : > { %629 = vrcp.f32 %v313_v20 }
 0x12b   : > { %631 = vrcp.f32 %v314_v22 }
 0x134   : > { %v630_v25 = vpop.eup %629 }
 0x135   : > { %v632_v26 = vpop.eup %631  ;;  %v322_v27 = vrot.slane %v630_v25, %v321_v24 }
 0x136   : > { %v326_v28 = vrot.slane %v632_v26, %v321_v24 }
 0x137   : > { %v327_v29 = vmul.f32 %v322_v27, %v934_v3  ;;  %v329_v30 = vmul.f32 %v322_v27, %v938_v5  ;;  %v331_v31 = vmul.f32 %v322_v27, %v948_v10  ;;  %v333_v32 = vmul.f32 %v322_v27, %v950_v11 }
 0x138   : > { %v328_v33 = vmul.f32 %v326_v28, %v930_v1  ;;  %v330_v34 = vmul.f32 %v326_v28, %v932_v2  ;;  %v332_v35 = vmul.f32 %v326_v28, %v940_v6  ;;  %v334_v36 = vmul.f32 %v326_v28, %v942_v7 }
 0x139   : > { %335 = vst [vmem:[%s212_s9] sm:$0xff] %v327_v29  ;;  %337 = vst [vmem:[%s212_s9 + $0x10] sm:$0xff] %v329_v30  ;;  %v343_v37 = vsub.f32 %v934_v3, %v327_v29  ;;  %v345_v38 = vsub.f32 %v938_v5, %v329_v30  ;;  %v347_v39 = vsub.f32 %v948_v10, %v331_v31 }
 0x13a   : > { %339 = vst [vmem:[%s212_s9 + $0x20] sm:$0xff] %v331_v31  ;;  %341 = vst [vmem:[%s212_s9 + $0x30] sm:$0xff] %v333_v32  ;;  %v349_v40 = vsub.f32 %v950_v11, %v333_v32  ;;  %v344_v41 = vsub.f32 %v930_v1, %v328_v33  ;;  %v346_v42 = vsub.f32 %v932_v2, %v330_v34 }
 0x13b   : > { %336 = vst [vmem:[%s212_s9 + $0x8] sm:$0xff] %v328_v33  ;;  %338 = vst [vmem:[%s212_s9 + $0x18] sm:$0xff] %v330_v34  ;;  %v348_v43 = vsub.f32 %v940_v6, %v332_v35  ;;  %v350_v44 = vsub.f32 %v942_v7, %v334_v36 }
 0x13c   : > { %340 = vst [vmem:[%s212_s9 + $0x28] sm:$0xff] %v332_v35  ;;  %342 = vst [vmem:[%s212_s9 + $0x38] sm:$0xff] %v334_v36 }
 0x13d   : > { %351 = vst [vmem:[%s973_s29] sm:$0xff] %v343_v37  ;;  %353 = vst [vmem:[%s973_s29 + $0x10] sm:$0xff] %v345_v38 }
 0x13e   : > { %355 = vst [vmem:[%s973_s29 + $0x20] sm:$0xff] %v347_v39  ;;  %357 = vst [vmem:[%s973_s29 + $0x30] sm:$0xff] %v349_v40 }
 0x13f   : > { %676 = shalt.err (!%p673_p5)
}
 0x140   : > { %s677_s6 = scalar_lea.hbm %s964_s28, 1024  ;;  %s681_s22 = scalar_lea.hbm %s1084_s2, 2048 }
 0x141   : > { %p678_p4 = scmp.ne.s32.totalorder %s964_s28, %s677_s6  ;;  %p682_p12 = scmp.lt.u32.totalorder %s964_s28, %s1084_s2 }
 0x142   : > { %p683_p1 = scmp.lt.u32.totalorder %s681_s22, %s677_s6  ;;  %p685_p8 = scmp.lt.u32.totalorder %s677_s6, %s964_s28 }
 0x143   : > { %p679_p7 = pnand %p678_p4, %p1093_p9 }
 0x144   : > { %p684_p3 = por %p683_p1, %p682_p12 }
 0x145   : > { %p680_p10 = pneg %p679_p7 }
 0x146   : > { %p686_p11 = por %p685_p8, %p684_p3 }
 0x148   : > { %p687_p0 = pnand %p686_p11, %p680_p10 }
 0x14a   : > { %690 = shalt.err (!%p687_p0)
}
 0x14b   : > { %s784_s5 = smov 256   ;;  %s785_s19 = smov 16   ;;  %352 = vst [vmem:[%s973_s29 + $0x8] sm:$0xff] %v344_v41  ;;  %354 = vst [vmem:[%s973_s29 + $0x18] sm:$0xff] %v346_v42 }
 0x14c   : > { %555 = dma.vmem_to_hbm [thread:$0]  (%p1093_p9), %s970_s10, 1024, %s964_s28, %s360_s18, %s784_s5, %s784_s5, %s785_s19  }
 0x14d   : > { %356 = vst [vmem:[%s973_s29 + $0x28] sm:$0xff] %v348_v43  ;;  %358 = vst [vmem:[%s973_s29 + $0x38] sm:$0xff] %v350_v44  ;;  %s365_s21 = scalar_lea.sflag [#allocation7], %s919_s11  ;;  %s691_s15 = scalar_lea.vmem %s995_s30, 1024 }
 0x14e   : > { %p692_p6 = scmp.ne.s32.totalorder %s995_s30, %s691_s15  ;;  %s786_s24 = smov [#allocation6]  }
 0x14f   : > { %s695_s6 = sshll.u32 %s786_s24, 4  ;;  %s696_s6 = int_to_ptr.vmem [resolvable:$false] %s695_s6 }
 0x150   : > { %p693_p13 = pnand %p692_p6, %p1093_p9  ;;  %s697_s8 = scalar_lea.vmem %s696_s6, 2048 }
 0x151   : > { %p698_p5 = scmp.lt.s32.totalorder %s995_s30, %s696_s6  ;;  %p699_p4 = scmp.lt.s32.totalorder %s697_s8, %s691_s15 }
 0x152   : > { %p694_p2 = pneg %p693_p13 }
 0x153   : > { %p700_p7 = por %p699_p4, %p698_p5 }
 0x155   : > { %p701_p10 = pnand %p700_p7, %p694_p2 }
 0x157   : > { %704 = shalt.err (!%p701_p10)
}
 0x158   : > { %s705_s10 = scalar_lea.hbm %s993_s7, 1024  ;;  %s709_s18 = scalar_lea.hbm %s1085_s3, 2048 }
 0x159   : > { %p706_p12 = scmp.ne.s32.totalorder %s993_s7, %s705_s10  ;;  %p710_p8 = scmp.lt.u32.totalorder %s993_s7, %s1085_s3 }
 0x15a   : > { %p711_p11 = scmp.lt.u32.totalorder %s709_s18, %s705_s10  ;;  %p713_p6 = scmp.lt.u32.totalorder %s705_s10, %s993_s7 }
 0x15b   : > { %p707_p1 = pnand %p706_p12, %p1093_p9 }
 0x15c   : > { %p712_p0 = por %p711_p11, %p710_p8 }
 0x15d   : > { %p708_p3 = pneg %p707_p1 }
 0x15e   : > { %p714_p13 = por %p713_p6, %p712_p0 }
 0x160   : > { %p715_p2 = pnand %p714_p13, %p708_p3 }
 0x162   : > { %718 = shalt.err (!%p715_p2)
}
 0x163   : > { %556 = dma.vmem_to_hbm [thread:$0]  (%p1093_p9), %s995_s30, 1024, %s993_s7, %s365_s21, %s784_s5, %s784_s5, %s785_s19  }
 0x164 PF: > { %s413_s23 = sand.u32 1, %s757_s12   ;;  %p1094_p5 = scmp.ne.s32.totalorder %s1090_s27, 0 }
 0x165   : > { %p1095_p4 = scmp.ge.s32.totalorder %s777_s17, 2  ;;  %s414_s4 = scalar_lea.sflag [#allocation4], %s413_s23 }
 0x167   : > { %p564_p7 = pnand %p1095_p4, %p1094_p5 }
 0x169   : > { %748 = dma.done.wait (!%p564_p7), %s414_s4, 1024  }
 0x16a   : > { %750 = vsyncadd (!%p564_p7), %s414_s4, 4294966272  ;;  %s423_s25 = scalar_lea.sflag [#allocation7], %s413_s23 }
 0x16b   : > { %752 = dma.done.wait (!%p564_p7), %s423_s25, 1024  }
 0x16c   : > { %754 = vsyncadd (!%p564_p7), %s423_s25, 4294966272  ;;  %s23_s17 = sadd.s32 1, %s777_s17   ;;  %s1096_s12 = smov %s761_s13 }
 0x16d   : > { %p20_p10 = scmp.ge.s32.totalorder %s23_s17, 4   ;;  %s1097_s13 = smov %s765_s14 }
 0x16e   : > { %s1098_s14 = smov %s863_s26  ;;  %s1099_s15 = smov %s773_s16 }
 0x16f   : > { %s1100_s16 = smov %s1102_s20  ;;  %22 = sbr.rel (!%p20_p10) target bundleno = 8 (0x8), region = 90 }
 0x176   :  { %428 = vsyncpa [#allocation3], 1 }
 0x177   :  { %430 = vsyncpa [#allocation3 + $0x1], 1 }
 0x178   :  { %431 = vsyncpa [#allocation4], 1 }
 0x179   :  { %433 = vsyncpa [#allocation4 + $0x1], 1 }
 0x17a   :  { %434 = vsyncpa [#allocation7], 1 }
 0x17b   :  { %436 = vsyncpa [#allocation7 + $0x1], 1 }

</bundles_post_ra>
